<compile_context>
chip_gen: v7x
topology: tpu7x:2x2x1
jax: 0.10.0
libtpu: 0.0.40
codegen_flags: <defaults>
</compile_context>

<pallas_src>
import functools

import jax
import jax.numpy as jnp
from jax import lax
from jax.experimental import pallas as pl
from jax.experimental.pallas import tpu as pltpu


def _ffn_kernel(x_ref, w1t_ref, b1_ref, w2_ref, b2_ref, o_ref, acc_ref=None):
    # x_ref:  (tm, d_model)        w1t_ref: (tk, d_model)   b1_ref: (1, tk)
    # w2_ref: (tk, d_model)        b2_ref:  (1, d_model)
    # o_ref:  (tm, d_model)        acc_ref: (tm, d_model) f32 (bf16 outputs only)
    acc = o_ref if acc_ref is None else acc_ref
    k = pl.program_id(1)

    x = x_ref[...]
    # First matmul chunk: contract x's feature dim with W1^T's feature dim
    # ((tm, d) x (tk, d) -> (tm, tk)); W1^T row stripes are contiguous DMAs.
    h = lax.dot_general(
        x, w1t_ref[...],
        dimension_numbers=(((1,), (1,)), ((), ())),
        preferred_element_type=jnp.float32)
    h = jnp.maximum(h + b1_ref[...], 0.0)          # bias + ReLU (f32)
    # dropout == identity (eval mode)
    contrib = jnp.dot(h.astype(w2_ref.dtype), w2_ref[...],
                      preferred_element_type=jnp.float32)

    @pl.when(k == 0)
    def _():                                       # init folded into first step
        acc[...] = contrib.astype(acc.dtype)

    @pl.when(k != 0)
    def _():
        acc[...] += contrib.astype(acc.dtype)

    @pl.when(k == pl.num_programs(1) - 1)
    def _():                                       # b2 once; lane-dense store
        o_ref[...] = (acc[...].astype(jnp.float32) + b2_ref[...]).astype(o_ref.dtype)


def _round_up(n, m):
    return (n + m - 1) // m * m


def _vmem_footprint(tm, tk, d_model, in_it, out_it, use_scratch):
    # Double-buffered pipelined tiles + (optional) f32 accumulator.
    buf = 2 * (tm * d_model * in_it           # x tile
               + tk * d_model * in_it         # W1^T stripe
               + tk * 4                       # b1 chunk (<= f32)
               + tk * d_model * in_it         # W2 stripe
               + d_model * 4                  # b2
               + tm * d_model * out_it)       # output tile
    if use_scratch:
        buf += tm * d_model * 4
    return buf


@functools.partial(jax.jit, static_argnames=("tm", "tk", "compute_dtype"))
def feed_forward_block(x, w1, b1, w2, b2, *, tm=None, tk=512, compute_dtype=None):
    """x: (batch, seq, d_model); w1: (d_model, d_ff); b1: (d_ff,);
       w2: (d_ff, d_model); b2: (d_model,). Returns (batch, seq, d_model)."""
    batch, seq, d_model = x.shape
    d_ff = w1.shape[1]
    M = batch * seq

    out_dtype = x.dtype
    cdtype = jnp.dtype(compute_dtype) if compute_dtype is not None else jnp.dtype(x.dtype)
    in_it = cdtype.itemsize
    out_it = jnp.dtype(out_dtype).itemsize
    # f32 outputs accumulate directly into the resident output tile.
    use_scratch = jnp.dtype(out_dtype) != jnp.dtype(jnp.float32)

    if tm is None:
        # Arithmetic intensity vs streamed weights = 2*tm/itemsize flop/byte.
        tm = 512 if in_it >= 4 else 1024

    # ---- tile selection under this chip's physical VMEM budget -------------
    try:
        phys_vmem = int(pltpu.get_tpu_info().vmem_capacity_bytes)
    except Exception:                              # conservative fallback (v7x)
        phys_vmem = 64 << 20
    budget = max(phys_vmem - (8 << 20), 16 << 20)  # leave compiler headroom

    tm_eff = min(tm, _round_up(M, 8))              # sublane-aligned row tile
    tk_eff = min(tk, _round_up(d_ff, 128))         # lane-aligned d_ff tile
    while (_vmem_footprint(tm_eff, tk_eff, d_model, in_it, out_it, use_scratch)
           > budget and tk_eff > 128):
        tk_eff = max(128, (tk_eff // 2) // 128 * 128)
    while (_vmem_footprint(tm_eff, tk_eff, d_model, in_it, out_it, use_scratch)
           > budget and tm_eff > 8):
        tm_eff = max(8, _round_up(tm_eff // 2, 8))

    M_pad = _round_up(M, tm_eff)
    d_ff_pad = _round_up(d_ff, tk_eff)

    # ---- operand prep -------------------------------------------------------
    x2d = x.reshape(M, d_model)
    if M_pad != M:
        x2d = jnp.pad(x2d, ((0, M_pad - M), (0, 0)))
    w1t = w1.T                                     # (d_ff, d_model): contiguous stripes
    if d_ff_pad != d_ff:                           # zero-pad d_ff: no-op through ReLU
        pad = d_ff_pad - d_ff
        w1t = jnp.pad(w1t, ((0, pad), (0, 0)))
        b1 = jnp.pad(b1, ((0, pad),))
        w2 = jnp.pad(w2, ((0, pad), (0, 0)))
    x2d = x2d.astype(cdtype)
    w1t = w1t.astype(cdtype)
    w2 = w2.astype(cdtype)
    b1_2d = b1.reshape(1, d_ff_pad)
    b2_2d = b2.reshape(1, d_model)

    grid = (M_pad // tm_eff, d_ff_pad // tk_eff)

    footprint = _vmem_footprint(tm_eff, tk_eff, d_model, in_it, out_it, use_scratch)
    vmem_bytes = int(min(budget, max(footprint + (4 << 20), 16 << 20)))

    flops = 4 * M_pad * d_model * d_ff_pad         # two matmuls, 2 flops per MAC
    bytes_accessed = int(
        M_pad * d_model * (in_it + out_it)                       # x in, y out
        + grid[0] * (2 * d_ff_pad * d_model * in_it              # streamed W1/W2
                     + d_ff_pad * 4 + d_model * 4))              # biases

    scratch = [pltpu.VMEM((tm_eff, d_model), jnp.float32)] if use_scratch else []

    out2d = pl.pallas_call(
        _ffn_kernel,
        out_shape=jax.ShapeDtypeStruct((M_pad, d_model), out_dtype),
        grid_spec=pltpu.PrefetchScalarGridSpec(
            num_scalar_prefetch=0,
            grid=grid,
            in_specs=[
                pl.BlockSpec((tm_eff, d_model), lambda i, k: (i, 0)),   # x rows
                pl.BlockSpec((tk_eff, d_model), lambda i, k: (k, 0)),   # W1^T stripe
                pl.BlockSpec((1, tk_eff), lambda i, k: (0, k)),         # b1 chunk
                pl.BlockSpec((tk_eff, d_model), lambda i, k: (k, 0)),   # W2 stripe
                pl.BlockSpec((1, d_model), lambda i, k: (0, 0)),        # b2
            ],
            out_specs=pl.BlockSpec((tm_eff, d_model), lambda i, k: (i, 0)),
            scratch_shapes=scratch,
        ),
        compiler_params=pltpu.CompilerParams(
            # TODO(synk): on v7x, when M_pad // tm_eff < 2 consider splitting
            # the k axis across the two TensorCores with partial accumulators.
            dimension_semantics=("parallel", "arbitrary"),
            vmem_limit_bytes=vmem_bytes,
        ),
        cost_estimate=pl.CostEstimate(
            flops=flops, transcendentals=0, bytes_accessed=bytes_accessed),
    )(x2d, w1t, b1_2d, w2, b2_2d)

    return out2d[:M].reshape(batch, seq, d_model)


def _init_params(key, d_model, d_ff, dtype=jnp.float32):
    # Deterministic synthetic init matching nn.Linear shapes.
    # PyTorch Linear stores weight as (out, in); we keep (in, out) for x @ W.
    k1, k2, k3, k4 = jax.random.split(key, 4)
    w1 = jax.random.normal(k1, (d_model, d_ff), dtype) * (1.0 / jnp.sqrt(d_model))
    b1 = jax.random.normal(k2, (d_ff,), dtype) * 0.01
    w2 = jax.random.normal(k3, (d_ff, d_model), dtype) * (1.0 / jnp.sqrt(d_ff))
    b2 = jax.random.normal(k4, (d_model,), dtype) * 0.01
    return w1, b1, w2, b2


if __name__ == "__main__":
    batch, seq, d_model, d_ff = 2, 8, 32, 128

    key = jax.random.PRNGKey(0)
    kx, kp = jax.random.split(key)
    x = jax.random.normal(kx, (batch, seq, d_model), jnp.float32)
    w1, b1, w2, b2 = _init_params(kp, d_model, d_ff)

    out = jax.block_until_ready(feed_forward_block(x, w1, b1, w2, b2))

    # Pure-JAX reference (dropout = identity in eval mode).
    ref = jnp.maximum(x @ w1 + b1, 0.0) @ w2 + b2
    assert out.shape == (batch, seq, d_model)
    assert jnp.allclose(out, ref, atol=1e-4, rtol=1e-4), "mismatch vs reference"

    # Ragged row count (exercises the M-padding path).
    x_odd = jax.random.normal(kx, (3, 5, d_model), jnp.float32)
    out_odd = jax.block_until_ready(feed_forward_block(x_odd, w1, b1, w2, b2))
    ref_odd = jnp.maximum(x_odd @ w1 + b1, 0.0) @ w2 + b2
    assert jnp.allclose(out_odd, ref_odd, atol=1e-4, rtol=1e-4), "padded-path mismatch"

    # bf16-operand compute path (f32 accumulation, f32 output); loose tolerance.
    out_bf16 = jax.block_until_ready(
        feed_forward_block(x, w1, b1, w2, b2, compute_dtype=jnp.bfloat16))
    assert jnp.allclose(out_bf16, ref, atol=0.15, rtol=0.1), "bf16 compute mismatch"

    # d_ff that is not a multiple of 128 (exercises the d_ff zero-pad path).
    d_ff_odd = 200
    w1o, b1o, w2o, b2o = _init_params(kp, d_model, d_ff_odd)
    out_o = jax.block_until_ready(feed_forward_block(x, w1o, b1o, w2o, b2o))
    ref_o = jnp.maximum(x @ w1o + b1o, 0.0) @ w2o + b2o
    assert jnp.allclose(out_o, ref_o, atol=1e-4, rtol=1e-4), "d_ff-pad mismatch"

    print("KERNEL_OK")
</pallas_src>

<mosaic_0001>
module attributes {stable_mosaic.version = 11 : i64} {
  func.func @_ffn_kernel(%arg0: i32, %arg1: i32, %arg2: memref<16x32xf32, #tpu.memory_space<vmem>>, %arg3: memref<128x32xf32, #tpu.memory_space<vmem>>, %arg4: memref<1x128xf32, #tpu.memory_space<vmem>>, %arg5: memref<128x32xf32, #tpu.memory_space<vmem>>, %arg6: memref<1x32xf32, #tpu.memory_space<vmem>>, %arg7: memref<16x32xf32, #tpu.memory_space<vmem>>) attributes {dimension_semantics = [#tpu.dimension_semantics<parallel>, #tpu.dimension_semantics<arbitrary>], iteration_bounds = array<i64: 1, 1>, scalar_prefetch = 0 : i64, scratch_operands = 0 : i64, tpu.core_type = #tpu.core_type<tc>, window_params = [{transform_indices = @transform_0, window_bounds = array<i64: 16, 32>}, {transform_indices = @transform_1, window_bounds = array<i64: 128, 32>}, {transform_indices = @transform_2, window_bounds = array<i64: 1, 128>}, {transform_indices = @transform_3, window_bounds = array<i64: 128, 32>}, {pipeline_mode = #tpu.pipeline_mode<synchronous>, transform_indices = @transform_4, window_bounds = array<i64: 1, 32>}, {transform_indices = @transform_5, window_bounds = array<i64: 16, 32>}]} {
    %c0 = arith.constant 0 : index
    %c0_0 = arith.constant 0 : index
    %0 = vector.load %arg2[%c0, %c0_0] : memref<16x32xf32, #tpu.memory_space<vmem>>, vector<16x32xf32>
    %c0_1 = arith.constant 0 : index
    %c0_2 = arith.constant 0 : index
    %1 = vector.load %arg3[%c0_1, %c0_2] : memref<128x32xf32, #tpu.memory_space<vmem>>, vector<128x32xf32>
    %cst = arith.constant dense<0.000000e+00> : vector<16x128xf32>
    %2 = tpu.matmul %0, %1, %cst {dimension_numbers = #tpu.dot_dimension_numbers<[1], [1], [0], [0], [0, 0, 1, 0], [], []>} : vector<16x32xf32>, vector<128x32xf32>, vector<16x128xf32> -> vector<16x128xf32>
    %c0_3 = arith.constant 0 : index
    %c0_4 = arith.constant 0 : index
    %3 = vector.load %arg4[%c0_3, %c0_4] : memref<1x128xf32, #tpu.memory_space<vmem>>, vector<1x128xf32>
    %4 = vector.broadcast %3 : vector<1x128xf32> to vector<16x128xf32>
    %5 = arith.addf %2, %4 : vector<16x128xf32>
    %cst_5 = arith.constant 0.000000e+00 : f32
    %6 = vector.broadcast %cst_5 : f32 to vector<16x128xf32>
    %7 = arith.maximumf %5, %6 : vector<16x128xf32>
    %c0_6 = arith.constant 0 : index
    %c0_7 = arith.constant 0 : index
    %8 = vector.load %arg5[%c0_6, %c0_7] : memref<128x32xf32, #tpu.memory_space<vmem>>, vector<128x32xf32>
    %cst_8 = arith.constant dense<0.000000e+00> : vector<16x32xf32>
    %9 = tpu.matmul %7, %8, %cst_8 {dimension_numbers = #tpu.dot_dimension_numbers<[1], [0], [0], [1], [0, 0, 1, 1], [], []>} : vector<16x128xf32>, vector<128x32xf32>, vector<16x32xf32> -> vector<16x32xf32>
    %c0_i32 = arith.constant 0 : i32
    %10 = arith.cmpi eq, %arg1, %c0_i32 : i32
    %11 = arith.extui %10 : i1 to i32
    %c0_i32_9 = arith.constant 0 : i32
    %12 = arith.cmpi ne, %11, %c0_i32_9 : i32
    scf.if %12 {
      %c0_14 = arith.constant 0 : index
      %c0_15 = arith.constant 0 : index
      %19 = vector.load %arg7[%c0_14, %c0_15] : memref<16x32xf32, #tpu.memory_space<vmem>>, vector<16x32xf32>
      tpu.vector_store %arg7[%c0_14, %c0_15], %9 {strides = array<i32>} : memref<16x32xf32, #tpu.memory_space<vmem>>, vector<16x32xf32>,
    } else {
    }
    %c0_i32_10 = arith.constant 0 : i32
    %13 = arith.cmpi ne, %arg1, %c0_i32_10 : i32
    %14 = arith.extui %13 : i1 to i32
    %c0_i32_11 = arith.constant 0 : i32
    %15 = arith.cmpi ne, %14, %c0_i32_11 : i32
    scf.if %15 {
      %c0_14 = arith.constant 0 : index
      %c0_15 = arith.constant 0 : index
      %19 = vector.load %arg7[%c0_14, %c0_15] : memref<16x32xf32, #tpu.memory_space<vmem>>, vector<16x32xf32>
      %20 = arith.addf %19, %9 : vector<16x32xf32>
      %c0_16 = arith.constant 0 : index
      %c0_17 = arith.constant 0 : index
      %21 = vector.load %arg7[%c0_16, %c0_17] : memref<16x32xf32, #tpu.memory_space<vmem>>, vector<16x32xf32>
      tpu.vector_store %arg7[%c0_16, %c0_17], %20 {strides = array<i32>} : memref<16x32xf32, #tpu.memory_space<vmem>>, vector<16x32xf32>,
    } else {
    }
    %c0_i32_12 = arith.constant 0 : i32
    %16 = arith.cmpi eq, %arg1, %c0_i32_12 : i32
    %17 = arith.extui %16 : i1 to i32
    %c0_i32_13 = arith.constant 0 : i32
    %18 = arith.cmpi ne, %17, %c0_i32_13 : i32
    scf.if %18 {
      %c0_14 = arith.constant 0 : index
      %c0_15 = arith.constant 0 : index
      %19 = vector.load %arg7[%c0_14, %c0_15] : memref<16x32xf32, #tpu.memory_space<vmem>>, vector<16x32xf32>
      %c0_16 = arith.constant 0 : index
      %c0_17 = arith.constant 0 : index
      %20 = vector.load %arg6[%c0_16, %c0_17] : memref<1x32xf32, #tpu.memory_space<vmem>>, vector<1x32xf32>
      %21 = vector.broadcast %20 : vector<1x32xf32> to vector<16x32xf32>
      %22 = arith.addf %19, %21 : vector<16x32xf32>
      %c0_18 = arith.constant 0 : index
      %c0_19 = arith.constant 0 : index
      %23 = vector.load %arg7[%c0_18, %c0_19] : memref<16x32xf32, #tpu.memory_space<vmem>>, vector<16x32xf32>
      tpu.vector_store %arg7[%c0_18, %c0_19], %22 {strides = array<i32>} : memref<16x32xf32, #tpu.memory_space<vmem>>, vector<16x32xf32>,
    } else {
    }
    return
  }
  func.func @transform_0(%arg0: i32, %arg1: i32) -> (i32, i32) {
    %c0_i32 = arith.constant 0 : i32
    %c0_i32_0 = arith.constant 0 : i32
    return %arg0, %c0_i32 : i32, i32
  }
  func.func @transform_1(%arg0: i32, %arg1: i32) -> (i32, i32) {
    %c0_i32 = arith.constant 0 : i32
    %c0_i32_0 = arith.constant 0 : i32
    return %arg1, %c0_i32 : i32, i32
  }
  func.func @transform_2(%arg0: i32, %arg1: i32) -> (i32, i32) {
    %c0_i32 = arith.constant 0 : i32
    %c0_i32_0 = arith.constant 0 : i32
    return %c0_i32, %arg1 : i32, i32
  }
  func.func @transform_3(%arg0: i32, %arg1: i32) -> (i32, i32) {
    %c0_i32 = arith.constant 0 : i32
    %c0_i32_0 = arith.constant 0 : i32
    return %arg1, %c0_i32 : i32, i32
  }
  func.func @transform_4(%arg0: i32, %arg1: i32) -> (i32, i32) {
    %c0_i32 = arith.constant 0 : i32
    %c0_i32_0 = arith.constant 0 : i32
    %c0_i32_1 = arith.constant 0 : i32
    return %c0_i32, %c0_i32_0 : i32, i32
  }
  func.func @transform_5(%arg0: i32, %arg1: i32) -> (i32, i32) {
    %c0_i32 = arith.constant 0 : i32
    %c0_i32_0 = arith.constant 0 : i32
    return %arg0, %c0_i32 : i32, i32
  }
}

</mosaic_0001>

<bundles_post_ra>
// kernel: feed_forward_block.1
= control target key start
LH: loop header
LB: loop body
LE: loop exit
PB: predicated region body
PF: predicated region fallthrough
CT: control target
= control target key end

     0   :  { %vm46_vm0 = vcmask 261120   ;;  %s747_s0 = inlined_call_operand.vmem [shape: f32[16,32], index: 0, kind: input, shape index: {}]   ;;  %s748_s1 = inlined_call_operand.vmem [shape: f32[128,32], index: 1, kind: input, shape index: {}]   ;;  %s749_s2 = inlined_call_operand.vmem [shape: f32[1,128], index: 2, kind: input, shape index: {}]   ;;  %s750_s3 = inlined_call_operand.vmem [shape: f32[128,32], index: 3, kind: input, shape index: {}]   ;;  %s751_s4 = inlined_call_operand.vmem [shape: f32[1,32], index: 4, kind: input, shape index: {}]   ;;  %s752_s5 = inlined_call_operand.hbm [shape: f32[16,32], index: 5, kind: output, shape index: {}]  }
   0x1   :  { %v23_v0 = vld [vmem:[%s748_s1] sm:$0xff]  ;;  %v24_v1 = vld [vmem:[%s748_s1 + $0x8] sm:$0xff]  ;;  %v25_v2 = vld [vmem:[%s748_s1 + $0x10] sm:$0xff] }
   0x2   :  { %v443_v3 = vpack.c.bf16 %v24_v1, %v23_v0  ;;  %vm594_vm1 = vmpackc.low %vm46_vm0, %vm46_vm0  ;;  %v26_v5 = vld [vmem:[%s748_s1 + $0x18] sm:$0xff]  ;;  %v27_v7 = vld [vmem:[%s748_s1 + $0x20] sm:$0xff] }
   0x3   :  { %v449_v6 = vpack.c.bf16 %v26_v5, %v25_v2  ;;  %v21_v8 = vld [vmem:[%s747_s0] sm:$0xff]  ;;  %v28_v9 = vld [vmem:[%s748_s1 + $0x28] sm:$0xff]  ;;  %v180_v13 = vld [vmem:[%s750_s3 + $0x10] sm:$0xff] }
   0x4   :  { %445 = vmatprep.subr.msk.bf16.mxu0 %vm594_vm1, %v443_v3  ;;  %405 = vmatprep.mubr.msk.f32.mxu0 %vm46_vm0, %v21_v8  ;;  %v178_v10 = vld [vmem:[%s750_s3] sm:$0xff]  ;;  %v179_v11 = vld [vmem:[%s750_s3 + $0x8] sm:$0xff]  ;;  %v181_v14 = vld [vmem:[%s750_s3 + $0x18] sm:$0xff]  ;;  %v455_v18 = vpack.c.bf16 %v28_v9, %v27_v7 }
   0x5   :  { %448 = vmatpush3.bf16.xpose.msk.msra.mxu0 %vm594_vm1, %v443_v3  ;;  %v491_v12 = vpack.c.bf16 %v179_v11, %v178_v10  ;;  %v495_v15 = vpack.c.bf16 %v181_v14, %v180_v13  ;;  %v182_v16 = vld [vmem:[%s750_s3 + $0x20] sm:$0xff]  ;;  %v183_v17 = vld [vmem:[%s750_s3 + $0x28] sm:$0xff] }
   0x6   :  { %451 = vmatprep.subr.msk.bf16.mxu0 %vm594_vm1, %v449_v6  ;;  %v499_v19 = vpack.c.bf16 %v183_v17, %v182_v16 }
   0x7   :  { %492 = vmatprep.subr.bf16.mxu1 %v491_v12 }
   0x8   :  { %494 = vmatpush3.bf16.msra.mxu1 %v491_v12 }
   0x9   :  { %496 = vmatprep.subr.bf16.mxu1 %v495_v15 }
   0xa   :  { %10 = vsyncpa [#allocation3], 0  ;;  %v184_v20 = vld [vmem:[%s750_s3 + $0x30] sm:$0xff]  ;;  %v185_v21 = vld [vmem:[%s750_s3 + $0x38] sm:$0xff]  ;;  %s550_s12 = smov [#allocation2]  }
   0xb   :  { %v29_v22 = vld [vmem:[%s748_s1 + $0x30] sm:$0xff]  ;;  %v30_v23 = vld [vmem:[%s748_s1 + $0x38] sm:$0xff]  ;;  %v503_v24 = vpack.c.bf16 %v185_v21, %v184_v20  ;;  %v186_v25 = vld [vmem:[%s750_s3 + $0x40] sm:$0xff] }
   0xc   :  { %498 = vmatpush3.bf16.msra.mxu1 %v495_v15  ;;  %v187_v26 = vld [vmem:[%s750_s3 + $0x48] sm:$0xff]  ;;  %v461_v27 = vpack.c.bf16 %v30_v23, %v29_v22  ;;  %v188_v29 = vld [vmem:[%s750_s3 + $0x50] sm:$0xff]  ;;  %v189_v30 = vld [vmem:[%s750_s3 + $0x58] sm:$0xff] }
   0xd   :  { %454 = vmatpush3.bf16.xpose.msk.msra.mxu0 %vm594_vm1, %v449_v6  ;;  %500 = vmatprep.subr.bf16.mxu1 %v499_v19  ;;  %v507_v28 = vpack.c.bf16 %v187_v26, %v186_v25  ;;  %v31_v31 = vld [vmem:[%s748_s1 + $0x40] sm:$0xff]  ;;  %v32_v32 = vld [vmem:[%s748_s1 + $0x48] sm:$0xff]  ;;  %v511_v33 = vpack.c.bf16 %v189_v30, %v188_v29  ;;  %v33_v38 = vld [vmem:[%s748_s1 + $0x50] sm:$0xff] }
   0xe   :  { %457 = vmatprep.subr.msk.bf16.mxu0 %vm594_vm1, %v455_v18  ;;  %v190_v34 = vld [vmem:[%s750_s3 + $0x60] sm:$0xff]  ;;  %v191_v35 = vld [vmem:[%s750_s3 + $0x68] sm:$0xff]  ;;  %v467_v36 = vpack.c.bf16 %v32_v32, %v31_v31  ;;  %v34_v39 = vld [vmem:[%s748_s1 + $0x58] sm:$0xff] }
   0xf   :  { %v515_v37 = vpack.c.bf16 %v191_v35, %v190_v34  ;;  %v473_v40 = vpack.c.bf16 %v34_v39, %v33_v38  ;;  %v35_v41 = vld [vmem:[%s748_s1 + $0x60] sm:$0xff]  ;;  %v36_v42 = vld [vmem:[%s748_s1 + $0x68] sm:$0xff]  ;;  %v37_v44 = vld [vmem:[%s748_s1 + $0x70] sm:$0xff] }
  0x10   :  { %502 = vmatpush3.bf16.msra.mxu1 %v499_v19  ;;  %v479_v43 = vpack.c.bf16 %v36_v42, %v35_v41  ;;  %v38_v45 = vld [vmem:[%s748_s1 + $0x78] sm:$0xff]  ;;  %v22_v47 = vld [vmem:[%s747_s0 + $0x8] sm:$0xff]  ;;  %v192_v48 = vld [vmem:[%s750_s3 + $0x70] sm:$0xff] }
  0x11   :  { %504 = vmatprep.subr.bf16.mxu1 %v503_v24  ;;  %v485_v46 = vpack.c.bf16 %v38_v45, %v37_v44  ;;  %v193_v49 = vld [vmem:[%s750_s3 + $0x78] sm:$0xff]  ;;  %v317_v51 = vld [vmem:[%s749_s2] ss:$0 sm:$0xff]  ;;  %s306_s2 = sshll.u32 %s550_s12, 4  ;;  %s307_s2 = int_to_ptr.vmem [resolvable:$true] %s306_s2 }
  0x12   :  { %v519_v50 = vpack.c.bf16 %v193_v49, %v192_v48  ;;  %v336_v60 = vld [vmem:[%s751_s4] ss:$0 sm:$0xff]  ;;  %s526_s13 = scalar_lea.vmem %s307_s2, 256  ;;  %p531_p1 = scmp.lt.s32.totalorder %s307_s2, %s307_s2 }
  0x13   :  { %p527_p0 = scmp.ne.s32.totalorder %s307_s2, %s526_s13  ;;  %p532_p2 = scmp.lt.s32.totalorder %s526_s13, %s526_s13 }
  0x14   :  { %506 = vmatpush3.bf16.msra.mxu1 %v503_v24 }
  0x15   :  { %460 = vmatpush3.bf16.xpose.msk.msra.mxu0 %vm594_vm1, %v455_v18  ;;  %508 = vmatprep.subr.bf16.mxu1 %v507_v28  ;;  %p533_p3 = por %p532_p2, %p531_p1 }
  0x16   :  { %463 = vmatprep.subr.msk.bf16.mxu0 %vm594_vm1, %v461_v27 }
  0x17   :  { %p534_p4 = pnand %p533_p3, %p527_p0 }
  0x18   :  { %510 = vmatpush3.bf16.msra.mxu1 %v507_v28 }
  0x19   :  { %512 = vmatprep.subr.bf16.mxu1 %v511_v33 }
  0x1c   :  { %514 = vmatpush3.bf16.msra.mxu1 %v511_v33 }
  0x1d   :  { %466 = vmatpush3.bf16.xpose.msk.msra.mxu0 %vm594_vm1, %v461_v27  ;;  %516 = vmatprep.subr.bf16.mxu1 %v515_v37 }
  0x1e   :  { %469 = vmatprep.subr.msk.bf16.mxu0 %vm594_vm1, %v467_v36 }
  0x20   :  { %518 = vmatpush3.bf16.msra.mxu1 %v515_v37 }
  0x21   :  { %520 = vmatprep.subr.bf16.mxu1 %v519_v50 }
  0x24   :  { %522 = vmatpush3.bf16.msra.mxu1 %v519_v50 }
  0x25   :  { %472 = vmatpush3.bf16.xpose.msk.msra.mxu0 %vm594_vm1, %v467_v36 }
  0x26   :  { %475 = vmatprep.subr.msk.bf16.mxu0 %vm594_vm1, %v473_v40 }
  0x2d   :  { %478 = vmatpush3.bf16.xpose.msk.msra.mxu0 %vm594_vm1, %v473_v40 }
  0x2e   :  { %481 = vmatprep.subr.msk.bf16.mxu0 %vm594_vm1, %v479_v43 }
  0x35   :  { %484 = vmatpush3.bf16.xpose.msk.msra.mxu0 %vm594_vm1, %v479_v43 }
  0x36   :  { %487 = vmatprep.subr.msk.bf16.mxu0 %vm594_vm1, %v485_v46 }
  0x3d   :  { %490 = vmatpush3.bf16.xpose.msk.msra.mxu0 %vm594_vm1, %v485_v46 }
  0x44   :  { %406 = vmatmul.mubr.msk.f32.vlgmr.msra.gmra.mrb[0].mxu0 %vm46_vm0, %v22_v47 }
 0x117   :  { %v407_v52 = vpop.f32.mrb[0].mxu0 }
 0x118   :  { %v173_v53 = vadd.f32 %v407_v52, %v317_v51  ;;  %v167_v54 = vpop.f32.mrb[1].mxu0 }
 0x119   :  { %v168_v55 = vadd.f32 %v317_v51, %v167_v54 }
 0x11a   :  { %v177_v57 = vmax.f32 %v173_v53, 0.0 }
 0x11b   :  { %v176_v56 = vmax.f32 %v168_v55, 0.0 }
 0x11d   :  { %440 = vmatprep.mubr.f32.mxu1 %v176_v56 }
 0x11e   :  { %441 = vmatmul.mubr.f32.vlgmr.msra.gmra.mrb[0].mxu1 %v177_v57 }
 0x1f1   :  { %v442_v58 = vpop.f32.mrb[0].mxu1 }
 0x1f2   :  { %274 = vst.msk [vmem:[#allocation2 + $0x8] sm:$0xff] %vm46_vm0, %v442_v58  ;;  %v260_v59 = vpop.f32.mrb[1].mxu1 }
 0x1f3   :  { %273 = vst.msk [vmem:[#allocation2] sm:$0xff] %vm46_vm0, %v260_v59 }
 0x1f9   :  { %v289_v61 = vld [vmem:[#allocation2 + $0x8] sm:$0xff] }
 0x1fa   :  { %v298_v62 = vadd.f32 %v336_v60, %v289_v61  ;;  %v288_v63 = vld [vmem:[#allocation2] sm:$0xff] }
 0x1fb   :  { %v297_v0 = vadd.f32 %v336_v60, %v288_v63 }
 0x1fc   :  { %300 = vst.msk [vmem:[#allocation2 + $0x8] sm:$0xff] %vm46_vm0, %v298_v62 }
 0x1fd   :  { %299 = vst.msk [vmem:[#allocation2] sm:$0xff] %vm46_vm0, %v297_v0 }
 0x1fe   :  { %537 = shalt.err (!%p534_p4)
}
 0x1ff   :  { %s538_s15 = scalar_lea.hbm %s752_s5, 256 }
 0x200   :  { %p539_p5 = scmp.ne.s32.totalorder %s752_s5, %s538_s15  ;;  %p542_p6 = scmp.lt.u32.totalorder %s538_s15, %s752_s5 }
 0x202   :  { %p544_p7 = pnand %p542_p6, %p539_p5 }
 0x204   :  { %547 = shalt.err (!%p544_p7)
}
 0x205   :  { %s551_s20 = smov 128   ;;  %s552_s21 = smov 8  }
 0x206   :  { %312 = dma.vmem_to_hbm [thread:$0]  %s307_s2, 256, %s752_s5, [#allocation3], %s551_s20, %s551_s20, %s552_s21  }
 0x207   :  { %548 = dma.done.wait [#allocation3], 256  }
 0x208   :  { %549 = vsyncadd [#allocation3], 4294967040 }
 0x209   :  { %316 = vsyncpa [#allocation3], 1 }

</bundles_post_ra>
